<compile_context>
chip_gen: v6e
topology: v6e:2x2x1
jax: 0.10.0
libtpu: 0.0.40
codegen_flags: <defaults>
</compile_context>

<pallas_src>
import jax
import jax.numpy as jnp
from jax.experimental import pallas as pl
from jax.experimental.pallas import tpu as pltpu


def _make_pool_kernel(HW, THW, num_t, ragged):
    """Pooling + channel-attention MLP.  Grid = (N, num_hw_tiles)."""
    inv_hw = 1.0 / float(HW)

    def kernel(x_ref, w1_ref, w2_ref, att_ref, sum_sc, max_sc):
        t = pl.program_id(1)

        @pl.when(t == 0)
        def _():
            sum_sc[...] = jnp.zeros_like(sum_sc)
            max_sc[...] = jnp.full_like(max_sc, -jnp.inf)

        x = x_ref[...]  # (1, C, THW), native dtype (no full-tile f32 upcast)
        if ragged:
            # Mask the padded tail of the last HW tile: 0 for the sum, -inf for max.
            valid = jnp.minimum(THW, HW - t * THW)
            lane = jax.lax.broadcasted_iota(jnp.int32, x.shape, 2)
            in_bounds = lane < valid
            xs = jnp.where(in_bounds, x, jnp.zeros_like(x))
            xm = jnp.where(in_bounds, x, jnp.full_like(x, -jnp.inf))
        else:
            xs = x
            xm = x

        # Accumulate pooling stats in f32 (per-channel, reduce over the lane axis).
        sum_sc[...] += jnp.sum(xs, axis=2, keepdims=True, dtype=jnp.float32)
        max_sc[...] = jnp.maximum(
            max_sc[...], jnp.max(xm, axis=2, keepdims=True).astype(jnp.float32))

        @pl.when(t == num_t - 1)
        def _():
            avg = sum_sc[0] * inv_hw                       # (C, 1), mean over true HW
            mx = max_sc[0]                                 # (C, 1)
            pooled = jnp.concatenate([avg, mx], axis=1)    # (C, 2): both branches fused
            w1 = w1_ref[...].astype(jnp.float32)           # (Crp, C)  fc1 (zero-padded)
            w2 = w2_ref[...].astype(jnp.float32)           # (C, Crp)  fc2 (zero-padded)
            h = jnp.maximum(
                jnp.dot(w1, pooled, preferred_element_type=jnp.float32), 0.0)  # (Crp, 2)
            o2 = jnp.dot(w2, h, preferred_element_type=jnp.float32)            # (C, 2)
            att = jax.nn.sigmoid(o2[:, 0:1] + o2[:, 1:2])                      # (C, 1)
            att_ref[...] = att[None, :, :].astype(att_ref.dtype)

    return kernel


def _scale_kernel(x_ref, att_ref, o_ref):
    # (1, C, THW) * (1, C, 1): lane-broadcast of the per-channel weight, computed in
    # the input dtype (only att is cast) -> lane-dense, unmasked stores.
    o_ref[...] = x_ref[...] * att_ref[...].astype(o_ref.dtype)


def _pick_hw_tile(HW, C, itemsize):
    """HW tile: full extent when small, else a multiple of 128 sized for a ~2 MiB
    block (comfortably inside every generation's scoped VMEM once double-buffered
    for input and output, including v7x's 64 MiB physical VMEM)."""
    if HW <= 2048:
        return HW
    target = (2 * 1024 * 1024) // max(C * itemsize, 1)
    thw = max(512, min(int(target), 8192))
    thw = max(128, (thw // 128) * 128)
    return min(thw, ((HW + 127) // 128) * 128)


def detail_hold_block(x_nchw, w1, w2, *, hw_tile=None):
    """DetailHoldBlock forward: x * sigmoid(fc2(relu(fc1(avgpool))) + fc2(relu(fc1(maxpool)))).

    x_nchw: (N, C, H, W); w1: (Cr, C) fc1 1x1-conv weight; w2: (C, Cr) fc2 weight.
    """
    N, C, H, W = x_nchw.shape
    Cr = w1.shape[0]
    HW = H * W
    itemsize = jnp.dtype(x_nchw.dtype).itemsize

    x = x_nchw.reshape(N, C, HW)  # free view of contiguous NCHW (no transposes)

    THW = int(hw_tile) if hw_tile is not None else _pick_hw_tile(HW, C, itemsize)
    num_t = pl.cdiv(HW, THW)
    ragged = (num_t * THW != HW)

    # Zero-pad the reduced channel dim to >= 8 sublanes. Exact no-op: padded fc1
    # rows produce ReLU(0)=0 activations that hit zero fc2 columns.
    Crp = max(8, ((Cr + 7) // 8) * 8)
    if Crp != Cr:
        w1p = jnp.zeros((Crp, C), w1.dtype).at[:Cr, :].set(w1)
        w2p = jnp.zeros((C, Crp), w2.dtype).at[:, :Cr].set(w2)
    else:
        w1p, w2p = w1, w2

    block_bytes = C * THW * itemsize
    vmem_limit = int(min(max(6 * block_bytes + (2 << 20), 16 << 20), 48 << 20))
    w_bytes = 2 * Crp * C * jnp.dtype(w1.dtype).itemsize

    # --- pass 1: pooled channel attention -> (N, C, 1) f32 -------------------
    att = pl.pallas_call(
        _make_pool_kernel(HW, THW, num_t, ragged),
        out_shape=jax.ShapeDtypeStruct((N, C, 1), jnp.float32),
        grid_spec=pltpu.PrefetchScalarGridSpec(
            num_scalar_prefetch=0,
            grid=(N, num_t),
            in_specs=[
                pl.BlockSpec((1, C, THW), lambda b, t: (b, 0, t)),
                pl.BlockSpec((Crp, C), lambda b, t: (0, 0)),   # weights stay resident
                pl.BlockSpec((C, Crp), lambda b, t: (0, 0)),
            ],
            out_specs=pl.BlockSpec((1, C, 1), lambda b, t: (b, 0, 0)),
            scratch_shapes=[pltpu.VMEM((1, C, 1), jnp.float32),   # running sum
                            pltpu.VMEM((1, C, 1), jnp.float32)],  # running max
        ),
        compiler_params=pltpu.CompilerParams(
            dimension_semantics=("parallel", "arbitrary"),
            vmem_limit_bytes=vmem_limit),
        cost_estimate=pl.CostEstimate(
            flops=2 * N * C * HW + 8 * N * Crp * C,
            transcendentals=N * C,
            bytes_accessed=N * C * HW * itemsize + N * C * 4 + w_bytes),
    )(x, w1p, w2p)

    # --- pass 2: scale every spatial tile by its channel weight --------------
    out = pl.pallas_call(
        _scale_kernel,
        out_shape=jax.ShapeDtypeStruct((N, C, HW), x_nchw.dtype),
        grid_spec=pltpu.PrefetchScalarGridSpec(
            num_scalar_prefetch=0,
            grid=(N, num_t),
            in_specs=[
                pl.BlockSpec((1, C, THW), lambda b, t: (b, 0, t)),
                pl.BlockSpec((1, C, 1), lambda b, t: (b, 0, 0)),
            ],
            out_specs=pl.BlockSpec((1, C, THW), lambda b, t: (b, 0, t)),
        ),
        compiler_params=pltpu.CompilerParams(
            dimension_semantics=("parallel", "parallel"),
            vmem_limit_bytes=vmem_limit),
        cost_estimate=pl.CostEstimate(
            flops=N * C * HW,
            transcendentals=0,
            bytes_accessed=2 * N * C * HW * itemsize + N * C * 4),
    )(x, att)

    return out.reshape(N, C, H, W)


def _reference(x, w1, w2):
    # Pure-JAX reference matching the PyTorch module exactly (NCHW).
    avg = jnp.mean(x, axis=(2, 3))                       # (N, C)
    mx = jnp.max(x, axis=(2, 3))                         # (N, C)

    def mlp(p):
        h = jnp.maximum(p @ w1.T, 0.0)                   # (N, Cr)
        return h @ w2.T                                  # (N, C)

    att = jax.nn.sigmoid(mlp(avg) + mlp(mx))             # (N, C)
    return x * att[:, :, None, None]


if __name__ == "__main__":
    key = jax.random.PRNGKey(0)
    kx, k1, k2, kx2 = jax.random.split(key, 4)

    # ChannelAttention(reduction_ratio=16) needs C >= 16 so fc1 has >= 1 out channel.
    N, C, H, W = 2, 32, 16, 16
    Cr = C // 16
    x = jax.random.normal(kx, (N, C, H, W), dtype=jnp.float32)
    # Synthetic weights: nn.Conv2d(C, Cr, 1, bias=False) / nn.Conv2d(Cr, C, 1, bias=False)
    # with the trailing 1x1 dims squeezed.
    w1 = jax.random.normal(k1, (Cr, C), dtype=jnp.float32) * 0.1
    w2 = jax.random.normal(k2, (C, Cr), dtype=jnp.float32) * 0.1

    out = detail_hold_block(x, w1, w2)
    jax.block_until_ready(out)
    ref = _reference(x, w1, w2)
    assert out.shape == ref.shape and out.dtype == ref.dtype
    assert jnp.allclose(out, ref, atol=1e-5, rtol=1e-5), "mismatch vs reference (single tile)"

    # Also exercise the multi-HW-tile accumulation path (HW=1024 split into 4 tiles).
    x2 = jax.random.normal(kx2, (N, C, 32, 32), dtype=jnp.float32)
    out2 = detail_hold_block(x2, w1, w2, hw_tile=256)
    jax.block_until_ready(out2)
    ref2 = _reference(x2, w1, w2)
    assert jnp.allclose(out2, ref2, atol=1e-5, rtol=1e-5), "mismatch vs reference (tiled)"

    print("KERNEL_OK")
</pallas_src>

<mosaic_0001>
module attributes {stable_mosaic.version = 11 : i64} {
  func.func @kernel(%arg0: i32, %arg1: i32, %arg2: memref<1x32x256xf32, #tpu.memory_space<vmem>>, %arg3: memref<8x32xf32, #tpu.memory_space<vmem>>, %arg4: memref<32x8xf32, #tpu.memory_space<vmem>>, %arg5: memref<1x32x1xf32, #tpu.memory_space<vmem>>, %arg6: memref<1x32x1xf32, #tpu.memory_space<vmem>>, %arg7: memref<1x32x1xf32, #tpu.memory_space<vmem>>) attributes {dimension_semantics = [#tpu.dimension_semantics<parallel>, #tpu.dimension_semantics<arbitrary>], iteration_bounds = array<i64: 2, 1>, scalar_prefetch = 0 : i64, scratch_operands = 2 : i64, tpu.core_type = #tpu.core_type<tc>, window_params = [{transform_indices = @transform_0, window_bounds = array<i64: 1, 32, 256>}, {pipeline_mode = #tpu.pipeline_mode<synchronous>, transform_indices = @transform_1, window_bounds = array<i64: 8, 32>}, {pipeline_mode = #tpu.pipeline_mode<synchronous>, transform_indices = @transform_2, window_bounds = array<i64: 32, 8>}, {transform_indices = @transform_3, window_bounds = array<i64: 1, 32, 1>}]} {
    %c0_i32 = arith.constant 0 : i32
    %0 = arith.cmpi eq, %arg1, %c0_i32 : i32
    %1 = arith.extui %0 : i1 to i32
    %c0_i32_0 = arith.constant 0 : i32
    %2 = arith.cmpi ne, %1, %c0_i32_0 : i32
    scf.if %2 {
      %cst_18 = arith.constant 0.000000e+00 : f32
      %17 = vector.broadcast %cst_18 : f32 to vector<1x32x1xf32>
      %c0_19 = arith.constant 0 : index
      %c0_20 = arith.constant 0 : index
      %c0_21 = arith.constant 0 : index
      %18 = vector.load %arg6[%c0_19, %c0_20, %c0_21] : memref<1x32x1xf32, #tpu.memory_space<vmem>>, vector<1x32x1xf32>
      tpu.vector_store %arg6[%c0_19, %c0_20, %c0_21], %17 {strides = array<i32>} : memref<1x32x1xf32, #tpu.memory_space<vmem>>, vector<1x32x1xf32>,
      %cst_22 = arith.constant 0xFF800000 : f32
      %19 = vector.broadcast %cst_22 : f32 to vector<1x32x1xf32>
      %c0_23 = arith.constant 0 : index
      %c0_24 = arith.constant 0 : index
      %c0_25 = arith.constant 0 : index
      %20 = vector.load %arg7[%c0_23, %c0_24, %c0_25] : memref<1x32x1xf32, #tpu.memory_space<vmem>>, vector<1x32x1xf32>
      tpu.vector_store %arg7[%c0_23, %c0_24, %c0_25], %19 {strides = array<i32>} : memref<1x32x1xf32, #tpu.memory_space<vmem>>, vector<1x32x1xf32>,
    } else {
    }
    %c0 = arith.constant 0 : index
    %c0_1 = arith.constant 0 : index
    %c0_2 = arith.constant 0 : index
    %3 = vector.load %arg2[%c0, %c0_1, %c0_2] : memref<1x32x256xf32, #tpu.memory_space<vmem>>, vector<1x32x256xf32>
    %c0_3 = arith.constant 0 : index
    %c0_4 = arith.constant 0 : index
    %c0_5 = arith.constant 0 : index
    %4 = vector.load %arg6[%c0_3, %c0_4, %c0_5] : memref<1x32x1xf32, #tpu.memory_space<vmem>>, vector<1x32x1xf32>
    %cst = arith.constant dense<0.000000e+00> : vector<1x32xf32>
    %5 = vector.multi_reduction <add>, %3, %cst [2] : vector<1x32x256xf32> to vector<1x32xf32>
    %6 = vector.shape_cast %5 : vector<1x32xf32> to vector<1x32x1xf32>
    %7 = arith.addf %4, %6 : vector<1x32x1xf32>
    %c0_6 = arith.constant 0 : index
    %c0_7 = arith.constant 0 : index
    %c0_8 = arith.constant 0 : index
    %8 = vector.load %arg6[%c0_6, %c0_7, %c0_8] : memref<1x32x1xf32, #tpu.memory_space<vmem>>, vector<1x32x1xf32>
    tpu.vector_store %arg6[%c0_6, %c0_7, %c0_8], %7 {strides = array<i32>} : memref<1x32x1xf32, #tpu.memory_space<vmem>>, vector<1x32x1xf32>,
    %c0_9 = arith.constant 0 : index
    %c0_10 = arith.constant 0 : index
    %c0_11 = arith.constant 0 : index
    %9 = vector.load %arg7[%c0_9, %c0_10, %c0_11] : memref<1x32x1xf32, #tpu.memory_space<vmem>>, vector<1x32x1xf32>
    %cst_12 = arith.constant dense<0xFF800000> : vector<1x32xf32>
    %10 = vector.multi_reduction <maximumf>, %3, %cst_12 [2] : vector<1x32x256xf32> to vector<1x32xf32>
    %11 = vector.shape_cast %10 : vector<1x32xf32> to vector<1x32x1xf32>
    %12 = arith.maximumf %9, %11 : vector<1x32x1xf32>
    %c0_13 = arith.constant 0 : index
    %c0_14 = arith.constant 0 : index
    %c0_15 = arith.constant 0 : index
    %13 = vector.load %arg7[%c0_13, %c0_14, %c0_15] : memref<1x32x1xf32, #tpu.memory_space<vmem>>, vector<1x32x1xf32>
    tpu.vector_store %arg7[%c0_13, %c0_14, %c0_15], %12 {strides = array<i32>} : memref<1x32x1xf32, #tpu.memory_space<vmem>>, vector<1x32x1xf32>,
    %c0_i32_16 = arith.constant 0 : i32
    %14 = arith.cmpi eq, %arg1, %c0_i32_16 : i32
    %15 = arith.extui %14 : i1 to i32
    %c0_i32_17 = arith.constant 0 : i32
    %16 = arith.cmpi ne, %15, %c0_i32_17 : i32
    scf.if %16 {
      %c0_18 = arith.constant 0 : index
      %c0_19 = arith.constant 0 : index
      %c0_20 = arith.constant 0 : index
      %17 = vector.load %arg6[%c0_18, %c0_19, %c0_20] : memref<1x32x1xf32, #tpu.memory_space<vmem>>, vector<1x32x1xf32>
      %18 = vector.shape_cast %17 : vector<1x32x1xf32> to vector<32x1xf32>
      %cst_21 = arith.constant 3.906250e-03 : f32
      %19 = vector.broadcast %cst_21 : f32 to vector<32x1xf32>
      %20 = arith.mulf %18, %19 : vector<32x1xf32>
      %c0_22 = arith.constant 0 : index
      %c0_23 = arith.constant 0 : index
      %c0_24 = arith.constant 0 : index
      %21 = vector.load %arg7[%c0_22, %c0_23, %c0_24] : memref<1x32x1xf32, #tpu.memory_space<vmem>>, vector<1x32x1xf32>
      %22 = vector.shape_cast %21 : vector<1x32x1xf32> to vector<32x1xf32>
      %23 = tpu.concatenate %20, %22 in 1 : vector<32x1xf32>, vector<32x1xf32> -> vector<32x2xf32>
      %c0_25 = arith.constant 0 : index
      %c0_26 = arith.constant 0 : index
      %24 = vector.load %arg3[%c0_25, %c0_26] : memref<8x32xf32, #tpu.memory_space<vmem>>, vector<8x32xf32>
      %c0_27 = arith.constant 0 : index
      %c0_28 = arith.constant 0 : index
      %25 = vector.load %arg4[%c0_27, %c0_28] : memref<32x8xf32, #tpu.memory_space<vmem>>, vector<32x8xf32>
      %cst_29 = arith.constant dense<0.000000e+00> : vector<8x2xf32>
      %26 = tpu.matmul %24, %23, %cst_29 {dimension_numbers = #tpu.dot_dimension_numbers<[1], [0], [0], [1], [0, 0, 1, 1], [], []>} : vector<8x32xf32>, vector<32x2xf32>, vector<8x2xf32> -> vector<8x2xf32>
      %cst_30 = arith.constant 0.000000e+00 : f32
      %27 = vector.broadcast %cst_30 : f32 to vector<8x2xf32>
      %28 = arith.maximumf %26, %27 : vector<8x2xf32>
      %cst_31 = arith.constant dense<0.000000e+00> : vector<32x2xf32>
      %29 = tpu.matmul %25, %28, %cst_31 {dimension_numbers = #tpu.dot_dimension_numbers<[1], [0], [0], [1], [0, 0, 1, 1], [], []>} : vector<32x8xf32>, vector<8x2xf32>, vector<32x2xf32> -> vector<32x2xf32>
      %30 = vector.extract_strided_slice %29 {offsets = [0, 0], sizes = [32, 1], strides = [1, 1]} : vector<32x2xf32> to vector<32x1xf32>
      %31 = vector.extract_strided_slice %29 {offsets = [0, 1], sizes = [32, 1], strides = [1, 1]} : vector<32x2xf32> to vector<32x1xf32>
      %32 = arith.addf %30, %31 : vector<32x1xf32>
      %33 = arith.negf %32 : vector<32x1xf32>
      %34 = math.exp %33 : vector<32x1xf32>
      %cst_32 = arith.constant 1.000000e+00 : f32
      %35 = vector.broadcast %cst_32 : f32 to vector<32x1xf32>
      %36 = arith.addf %35, %34 : vector<32x1xf32>
      %37 = arith.divf %35, %36 : vector<32x1xf32>
      %38 = vector.shape_cast %37 : vector<32x1xf32> to vector<1x32x1xf32>
      %c0_33 = arith.constant 0 : index
      %c0_34 = arith.constant 0 : index
      %c0_35 = arith.constant 0 : index
      %39 = vector.load %arg5[%c0_33, %c0_34, %c0_35] : memref<1x32x1xf32, #tpu.memory_space<vmem>>, vector<1x32x1xf32>
      tpu.vector_store %arg5[%c0_33, %c0_34, %c0_35], %38 {strides = array<i32>} : memref<1x32x1xf32, #tpu.memory_space<vmem>>, vector<1x32x1xf32>,
    } else {
    }
    return
  }
  func.func @transform_0(%arg0: i32, %arg1: i32) -> (i32, i32, i32) {
    %c0_i32 = arith.constant 0 : i32
    %c0_i32_0 = arith.constant 0 : i32
    return %arg0, %c0_i32, %arg1 : i32, i32, i32
  }
  func.func @transform_1(%arg0: i32, %arg1: i32) -> (i32, i32) {
    %c0_i32 = arith.constant 0 : i32
    %c0_i32_0 = arith.constant 0 : i32
    %c0_i32_1 = arith.constant 0 : i32
    return %c0_i32, %c0_i32_0 : i32, i32
  }
  func.func @transform_2(%arg0: i32, %arg1: i32) -> (i32, i32) {
    %c0_i32 = arith.constant 0 : i32
    %c0_i32_0 = arith.constant 0 : i32
    %c0_i32_1 = arith.constant 0 : i32
    return %c0_i32, %c0_i32_0 : i32, i32
  }
  func.func @transform_3(%arg0: i32, %arg1: i32) -> (i32, i32, i32) {
    %c0_i32 = arith.constant 0 : i32
    %c0_i32_0 = arith.constant 0 : i32
    %c0_i32_1 = arith.constant 0 : i32
    return %arg0, %c0_i32, %c0_i32_0 : i32, i32, i32
  }
}

</mosaic_0001>

<bundles_post_ra>
// kernel: tpu_custom_call.1
= control target key start
LH: loop header
LB: loop body
LE: loop exit
PB: predicated region body
PF: predicated region fallthrough
CT: control target
= control target key end

     0   :  { %8 = vsyncpa [#allocation5], 0  ;;  %s1000_s0 = inlined_call_operand.hbm [shape: f32[2,32,256], index: 0, kind: input, shape index: {}]   ;;  %s1001_s1 = inlined_call_operand.vmem [shape: f32[8,32], index: 1, kind: input, shape index: {}]   ;;  %s1002_s2 = inlined_call_operand.vmem [shape: f32[32,8], index: 2, kind: input, shape index: {}]   ;;  %s1003_s3 = inlined_call_operand.vmem [shape: f32[2,32,1], index: 3, kind: output, shape index: {}]  }
   0x1   :  { %10 = vsyncpa [#allocation5 + $0x1], 0  ;;  %s856_s12 = smov 0   ;;  %s858_s13 = smov 0  }
   0x2   :  { %s860_s14 = smov 0   ;;  %s862_s15 = smov 0  }
   0x3   :  { %s864_s16 = smov 0   ;;  %s866_s17 = smov 0  }
   0x4 LB: > { %s617_s18 = sadd.s32 4294967295, %s826_s17   ;;  %s28_s19 = sadd.s32 1, %s822_s16  ;;  %s826_s17 = sphi %s866_s17, %s16_s17   ;;  %s822_s16 = sphi %s864_s16, %s1011_s16   ;;  %s818_s15 = sphi %s862_s15, %s1010_s15   ;;  %s814_s14 = sphi %s860_s14, %s1009_s14   ;;  %s810_s13 = sphi %s858_s13, %s1008_s13   ;;  %s806_s12 = sphi %s856_s12, %s1007_s12  }
   0x5   : > { %p30_p0 = scmp.ge.s32.totalorder %s28_s19, 2  ;;  %s37_s20 = sadd.s32 1, %s814_s14 }
   0x6   : > { %p44_p1 = scmp.ne.s32.totalorder %s814_s14, %s810_s13  ;;  %p45_p2 = scmp.eq.s32.totalorder %s826_s17, 0 }
   0x7   : > { %s1013_s19 = smov (%p30_p0, %s28_s19), 0  ;;  %p50_p4 = scmp.ne.s32.totalorder %s810_s13, %s806_s12 }
   0x8   : > { %p892_p3 = por %p45_p2, %p44_p1  ;;  %s32_s22 = ssub.s32 %s822_s16, %s1013_s19 }
   0x9   : > { %p51_p5 = scmp.eq.s32.totalorder %s617_s18, 0  ;;  %p35_p6 = scmp.eq.s32.totalorder %s32_s22, 0 }
   0xa   : > { %p676_p8 = scmp.lt.s32.totalorder %s826_s17, 2  ;;  %s148_s25 = sand.u32 1, %s814_s14  }
   0xb   : > { %p899_p7 = por %p51_p5, %p50_p4  ;;  %s639_s26 = sshll.u32 %s822_s16, 10 }
   0xc   : > { %s905_s24 = scalar_select %p35_p6, %s814_s14, %s37_s20  }
   0xd   : > { %s621_s27 = sshll.u32 %s148_s25, 6  ;;  %s160_s30 = scalar_lea.hbm %s1000_s0, %s639_s26 }
   0xe   : > { %s152_s4 = scalar_lea.vmem [#allocation4], %s621_s27  ;;  %p914_p9 = pnand %p676_p8, %p892_p3 }
   0xf   : > { %s161_s5 = sshll.u32 %s152_s4, 4  ;;  %s149_s7 = scalar_lea.sflag [#allocation5], %s148_s25  ;;  %s162_s5 = int_to_ptr.vmem [resolvable:$true] %s161_s5 }
  0x10   : > { %p750_p10 = pneg %p914_p9  ;;  %s761_s8 = scalar_lea.vmem %s162_s5, 1024 }
  0x11   : > { %p762_p11 = scmp.ne.s32.totalorder %s162_s5, %s761_s8  ;;  %s828_s9 = smov [#allocation4]  }
  0x12   : > { %s766_s10 = sshll.u32 %s828_s9, 4  ;;  %s767_s10 = int_to_ptr.vmem [resolvable:$false] %s766_s10 }
  0x13   : > { %p764_p12 = pnand %p762_p11, %p750_p10  ;;  %s768_s11 = scalar_lea.vmem %s767_s10, 2048 }
  0x14   : > { %p769_p0 = scmp.lt.s32.totalorder %s162_s5, %s767_s10  ;;  %p770_p1 = scmp.lt.s32.totalorder %s768_s11, %s761_s8 }
  0x15   : > { %p765_p13 = pneg %p764_p12 }
  0x16   : > { %p771_p2 = por %p770_p1, %p769_p0 }
  0x18   : > { %p772_p3 = pnand %p771_p2, %p765_p13 }
  0x1a   : > { %775 = shalt.err (!%p772_p3)
}
  0x1b   : > { %s829_s12 = smov 256   ;;  %s830_s18 = smov 16  }
  0x1c   : > { %675 = dma.hbm_to_vmem [thread:$0]  (!%p914_p9), %s160_s30, 1024, %s162_s5, %s149_s7, %s829_s12, %s829_s12, %s830_s18  }
  0x1d   : > { %p624_p4 = scmp.ge.s32.totalorder %s826_s17, 1  ;;  %p169_p5 = scmp.lt.s32.totalorder %s826_s17, 3 }
  0x1f   : > { %p170_p6 = pnand %p624_p4, %p169_p5 }
  0x20   : > { %s175_s20 = sand.u32 (!%p170_p6), 1, %s810_s13  }
  0x21   : > { %173 = sbr.rel (%p170_p6) target bundleno = 865 (0x361), region = 32  ;;  %s625_s21 = sshll.u32 (!%p170_p6), %s175_s20, 6 }
  0x22   : > { %s176_s22 = scalar_lea.sflag (!%p170_p6), [#allocation5], %s175_s20  ;;  %s179_s25 = scalar_lea.vmem (!%p170_p6), [#allocation4], %s625_s21 }
  0x26   : > { %801 = dma.done.wait (%p899_p7), %s176_s22, 1024  }
  0x27   : > { %803 = vsyncadd (%p899_p7), %s176_s22, 4294966272  ;;  %vm212_vm0 = vcmask 7168   ;;  %v831_v0 = vmov -inf   ;;  %v227_v1 = vld [vmem:[%s179_s25 + $0x30] sm:$0xff]  ;;  %v228_v2 = vld [vmem:[%s179_s25 + $0x38] sm:$0xff]  ;;  %v832_v17 = vmov 0.0  }
  0x28   : > { %220 = vst.msk [vmem:[#allocation3 + $0x18] sm:$0xff] %vm212_vm0, %v831_v0  ;;  %217 = vst.msk [vmem:[#allocation3] sm:$0xff] %vm212_vm0, %v831_v0  ;;  %v225_v3 = vld [vmem:[%s179_s25 + $0x20] sm:$0xff]  ;;  %v267_v4 = vmax.f32 %v227_v1, %v228_v2  ;;  %v226_v5 = vld [vmem:[%s179_s25 + $0x28] sm:$0xff]  ;;  %v242_v13 = vadd.f32 %v228_v2, %v227_v1  ;;  %651 = vmatprep.subr.mxu0 %v832_v17  ;;  %s833_s23 = smov 1   ;;  %vm834_vm1 = vmmov 0  }
  0x29   : > { %218 = vst.msk [vmem:[#allocation3 + $0x8] sm:$0xff] %vm212_vm0, %v831_v0  ;;  %219 = vst.msk [vmem:[#allocation3 + $0x10] sm:$0xff] %vm212_vm0, %v831_v0  ;;  %v223_v6 = vld [vmem:[%s179_s25 + $0x10] sm:$0xff]  ;;  %v224_v7 = vld [vmem:[%s179_s25 + $0x18] sm:$0xff]  ;;  %v264_v11 = vmax.f32 %v225_v3, %v226_v5  ;;  %v239_v14 = vadd.f32 %v226_v5, %v225_v3  ;;  %659 = vmatprep.mubr.msk.f32.mxu0 %vm834_vm1, %v832_v17  ;;  %vm318_vm2 = vcmask 261120   ;;  %vm393_vm3 = vcmask 64512  }
  0x2a   : > { %v261_v8 = vmax.f32 %v223_v6, %v224_v7  ;;  %v221_v9 = vld [vmem:[%s179_s25] sm:$0xff]  ;;  %v222_v10 = vld [vmem:[%s179_s25 + $0x8] sm:$0xff]  ;;  %268 = vmax.xlane.f32.xlu0 %v267_v4  ;;  %v236_v15 = vadd.f32 %v224_v7, %v223_v6  ;;  %216 = vst.msk [vmem:[#allocation2 + $0x18] sm:$0xff] %vm212_vm0, %v832_v17  ;;  %213 = vst.msk [vmem:[#allocation2] sm:$0xff] %vm212_vm0, %v832_v17  ;;  %s835_s9 = smov 127   ;;  %p203_p7 = scmp.lt.s32.totalorder %s818_s15, 1 }
  0x2b   : > { %v258_v12 = vmax.f32 %v221_v9, %v222_v10  ;;  %v233_v16 = vadd.f32 %v222_v10, %v221_v9  ;;  %214 = vst.msk [vmem:[#allocation2 + $0x8] sm:$0xff] %vm212_vm0, %v832_v17  ;;  %215 = vst.msk [vmem:[#allocation2 + $0x10] sm:$0xff] %vm212_vm0, %v832_v17  ;;  %v313_v61 = vld [vmem:[%s1001_s1] sm:$0xff]  ;;  %v315_v3 = vld [vmem:[%s1002_s2 + $0x8] sm:$0xff] }
  0x2c   : > { %262 = vmax.xlane.f32.xlu1 %v261_v8  ;;  %v314_v63 = vld [vmem:[%s1002_s2] sm:$0xff]  ;;  %v316_v4 = vld [vmem:[%s1002_s2 + $0x10] sm:$0xff]  ;;  %v317_v5 = vld [vmem:[%s1002_s2 + $0x18] sm:$0xff]  ;;  %s1015_s15 = smov (!%p203_p7, %s818_s15), 1 }
  0x2d   : > { %664 = vmatprep.mubr.msk.f32.mxu1 %vm393_vm3, %v314_v63  ;;  %s640_s10 = sshll.u32 %s1015_s15, 5 }
  0x2e   : > { %265 = vmax.xlane.f32.xlu0 %v264_v11  ;;  %s207_s18 = scalar_lea.vmem %s1003_s3, %s640_s10 }
  0x2f   : > { %v257_v18 = vld [vmem:[#allocation3 + $0x18] sm:$0xff]  ;;  %v254_v25 = vld [vmem:[#allocation3] sm:$0xff] }
  0x30   : > { %259 = vmax.xlane.f32.xlu1 %v258_v12  ;;  %v255_v19 = vld [vmem:[#allocation3 + $0x8] sm:$0xff]  ;;  %v256_v23 = vld [vmem:[#allocation3 + $0x10] sm:$0xff] }
  0x31   : > { %v232_v30 = vld [vmem:[#allocation2 + $0x18] sm:$0xff]  ;;  %v229_v38 = vld [vmem:[#allocation2] sm:$0xff] }
  0x32   : > { %243 = vadd.xlane.f32.xlu0 %v242_v13  ;;  %v231_v31 = vld [vmem:[#allocation2 + $0x10] sm:$0xff]  ;;  %v230_v37 = vld [vmem:[#allocation2 + $0x8] sm:$0xff] }
  0x34   : > { %240 = vadd.xlane.f32.xlu1 %v239_v14 }
  0x36   : > { %237 = vadd.xlane.f32.xlu0 %v236_v15 }
  0x38   : > { %234 = vadd.xlane.f32.xlu1 %v233_v16 }
  0xb3   : > { %v269_v20 = vpop.xlane.xlu0 %268 }
  0xb4   : > { %v273_v21 = vmax.f32 %v257_v18, %v269_v20 }
  0xb5   : > { %v263_v22 = vpop.xlane.xlu1 %262 }
  0xb6   : > { %v271_v24 = vmax.f32 %v255_v19, %v263_v22  ;;  %277 = vst.msk [vmem:[#allocation3 + $0x18] sm:$0xff] %vm212_vm0, %v273_v21 }
  0xb7   : > { %v266_v26 = vpop.xlane.xlu0 %265 }
  0xb8   : > { %275 = vst.msk [vmem:[#allocation3 + $0x8] sm:$0xff] %vm212_vm0, %v271_v24  ;;  %v272_v27 = vmax.f32 %v256_v23, %v266_v26 }
  0xb9   : > { %v260_v28 = vpop.xlane.xlu1 %259 }
  0xba   : > { %v270_v29 = vmax.f32 %v254_v25, %v260_v28  ;;  %276 = vst.msk [vmem:[#allocation3 + $0x10] sm:$0xff] %vm212_vm0, %v272_v27 }
  0xbb   : > { %v244_v32 = vpop.xlane.xlu0 %243 }
  0xbc   : > { %274 = vst.msk [vmem:[#allocation3] sm:$0xff] %vm212_vm0, %v270_v29  ;;  %v248_v33 = vadd.f32 %v244_v32, %v232_v30 }
  0xbd   : > { %v241_v34 = vpop.xlane.xlu1 %240  ;;  %v292_v35 = vld [vmem:[#allocation3 + $0x18] sm:$0xff] }
  0xbe   : > { %v247_v36 = vadd.f32 %v241_v34, %v231_v31  ;;  %303 = vrot.lane.b32.xlu0 %v292_v35, %s833_s23  ;;  %253 = vst.msk [vmem:[#allocation2 + $0x18] sm:$0xff] %vm212_vm0, %v248_v33 }
  0xbf   : > { %v238_v39 = vpop.xlane.xlu0 %237  ;;  %v290_v44 = vld [vmem:[#allocation3 + $0x8] sm:$0xff] }
  0xc0   : > { %252 = vst.msk [vmem:[#allocation2 + $0x10] sm:$0xff] %vm212_vm0, %v247_v36  ;;  %v246_v40 = vadd.f32 %v238_v39, %v230_v37 }
  0xc1   : > { %v235_v41 = vpop.xlane.xlu1 %234  ;;  %v291_v42 = vld [vmem:[#allocation3 + $0x10] sm:$0xff] }
  0xc2   : > { %v245_v43 = vadd.f32 %v235_v41, %v229_v38  ;;  %301 = vrot.lane.b32.xlu1 %v291_v42, %s833_s23  ;;  %251 = vst.msk [vmem:[#allocation2 + $0x8] sm:$0xff] %vm212_vm0, %v246_v40 }
  0xc3   : > { %v289_v45 = vld [vmem:[#allocation3] sm:$0xff] }
  0xc4   : > { %250 = vst.msk [vmem:[#allocation2] sm:$0xff] %vm212_vm0, %v245_v43 }
  0xc5   : > { %v284_v46 = vld [vmem:[#allocation2 + $0x18] sm:$0xff] }
  0xc6   : > { %299 = vrot.lane.b32.xlu1 %v290_v44, %s833_s23  ;;  %v288_v47 = vmul.f32 0.00390625, %v284_v46 }
  0xc7   : > { %v283_v48 = vld [vmem:[#allocation2 + $0x10] sm:$0xff] }
  0xc8   : > { %v287_v51 = vmul.f32 0.00390625, %v283_v48 }
  0xc9   : > { %v282_v52 = vld [vmem:[#allocation2 + $0x8] sm:$0xff] }
  0xca   : > { %297 = vrot.lane.b32.xlu1 %v289_v45, %s833_s23  ;;  %v286_v55 = vmul.f32 0.00390625, %v282_v52 }
  0xcb   : > { %v281_v56 = vld [vmem:[#allocation2] sm:$0xff] }
  0xcc   : > { %v285_v59 = vmul.f32 0.00390625, %v281_v56 }
 0x130   : > { %v304_v49 = vpop.permute.xlu0 %303 }
 0x131   : > { %v312_v50 = vsel %vm212_vm0, %v288_v47, %v304_v49 }
 0x132   : > { %652 = vmatpush3.msra.mxu0 %v312_v50 }
 0x133   : > { %653 = vmatprep.subr.mxu0 %v832_v17 }
 0x134   : > { %v302_v53 = vpop.permute.xlu1 %301 }
 0x135   : > { %v311_v54 = vsel %vm212_vm0, %v287_v51, %v302_v53 }
 0x136   : > { %654 = vmatpush3.msra.mxu0 %v311_v54 }
 0x137   : > { %655 = vmatprep.subr.mxu0 %v832_v17 }
 0x138   : > { %v300_v57 = vpop.permute.xlu1 %299 }
 0x139   : > { %v310_v58 = vsel %vm212_vm0, %v286_v55, %v300_v57 }
 0x13a   : > { %656 = vmatpush3.msra.mxu0 %v310_v58 }
 0x13b   : > { %657 = vmatprep.subr.mxu0 %v832_v17 }
 0x13c   : > { %v298_v60 = vpop.permute.xlu1 %297 }
 0x13d   : > { %v309_v62 = vsel %vm212_vm0, %v285_v59, %v298_v60 }
 0x13e   : > { %658 = vmatpush3.msra.mxu0 %v309_v62 }
 0x13f   : > { %660 = vmatmul.mubr.msk.f32.vlgmr.msra.gmra.mxu0 %vm318_vm2, %v313_v61 }
 0x1ff   : > { %v388_v0 = vpop.f32.mrf.mxu0 }
 0x200   : > { %v392_v1 = vmax.f32 %v388_v0, 0.0 }
 0x201   : > { %v661_v2 = vpop.f32.mrf.mxu0 }
 0x202   : > { %662 = vmatprep.subr.mxu1 %v392_v1 }
 0x203   : > { %663 = vmatpush3.msra.mxu1 %v392_v1 }
 0x204   : > { %665 = vmatmul.mubr.msk.f32.vlgmr.msra.gmra.mxu1 %vm393_vm3, %v315_v3 }
 0x205   : > { %667 = vmatprep.mubr.msk.f32.mxu1 %vm393_vm3, %v316_v4 }
 0x208   : > { %668 = vmatmul.mubr.msk.f32.gmra.mxu1 %vm393_vm3, %v317_v5 }
 0x2c4   : > { %v666_v6 = vpop.f32.mrf.mxu1 }
 0x2c5   : > { %497 = vrot.lane.b32.xlu1 %v666_v6, %s835_s9 }
 0x2c6   : > { %v472_v7 = vpop.f32.mrf.mxu1 }
 0x2c7   : > { %495 = vrot.lane.b32.xlu0 %v472_v7, %s835_s9 }
 0x2c8   : > { %v669_v8 = vpop.f32.mrf.mxu1 }
 0x2c9   : > { %501 = vrot.lane.b32.xlu1 %v669_v8, %s835_s9 }
 0x2ca   : > { %v482_v9 = vpop.f32.mrf.mxu1 }
 0x2cb   : > { %499 = vrot.lane.b32.xlu0 %v482_v9, %s835_s9 }
 0x337   : > { %v498_v10 = vpop.permute.xlu1 %497 }
 0x338   : > { %v508_v11 = vadd.f32 %v666_v6, %v498_v10 }
 0x339   : > { %v496_v12 = vpop.permute.xlu0 %495 }
 0x33a   : > { %v634_v13 = vmul.f32 -1.442695, %v508_v11  ;;  %v507_v14 = vadd.f32 %v496_v12, %v472_v7 }
 0x33b   : > { %v502_v15 = vpop.permute.xlu1 %501 }
 0x33c   : > { %732 = vpow2.f32 %v634_v13  ;;  %v633_v16 = vmul.f32 -1.442695, %v507_v14  ;;  %v510_v17 = vadd.f32 %v669_v8, %v502_v15 }
 0x33d   : > { %v500_v18 = vpop.permute.xlu0 %499 }
 0x33e   : > { %734 = vpow2.f32 %v633_v16  ;;  %v636_v19 = vmul.f32 -1.442695, %v510_v17  ;;  %v509_v20 = vadd.f32 %v500_v18, %v482_v9 }
 0x340   : > { %736 = vpow2.f32 %v636_v19  ;;  %v635_v21 = vmul.f32 -1.442695, %v509_v20 }
 0x342   : > { %738 = vpow2.f32 %v635_v21 }
 0x349   : > { %v733_v22 = vpop.eup %732 }
 0x34a   : > { %v524_v23 = vadd.f32 1.0, %v733_v22 }
 0x34b   : > { %v735_v24 = vpop.eup %734 }
 0x34c   : > { %740 = vrcp.f32 %v524_v23  ;;  %v523_v25 = vadd.f32 1.0, %v735_v24 }
 0x34d   : > { %v737_v26 = vpop.eup %736 }
 0x34e   : > { %742 = vrcp.f32 %v523_v25  ;;  %v526_v27 = vadd.f32 1.0, %v737_v26 }
 0x34f   : > { %v739_v28 = vpop.eup %738 }
 0x350   : > { %744 = vrcp.f32 %v526_v27  ;;  %v525_v29 = vadd.f32 1.0, %v739_v28 }
 0x352   : > { %746 = vrcp.f32 %v525_v29 }
 0x359   : > { %v741_v30 = vpop.eup %740 }
 0x35a   : > { %536 = vst.msk [vmem:[%s207_s18 + $0x8] sm:$0xff] %vm212_vm0, %v741_v30 }
 0x35b   : > { %v743_v31 = vpop.eup %742 }
 0x35c   : > { %535 = vst.msk [vmem:[%s207_s18] sm:$0xff] %vm212_vm0, %v743_v31 }
 0x35d   : > { %v745_v32 = vpop.eup %744 }
 0x35e   : > { %538 = vst.msk [vmem:[%s207_s18 + $0x18] sm:$0xff] %vm212_vm0, %v745_v32 }
 0x35f   : > { %v747_v33 = vpop.eup %746 }
 0x360   : > { %537 = vst.msk [vmem:[%s207_s18 + $0x10] sm:$0xff] %vm212_vm0, %v747_v33 }
 0x361 PF: > { %s16_s17 = sadd.s32 1, %s826_s17   ;;  %s1007_s12 = smov %s810_s13 }
 0x362   : > { %p13_p8 = scmp.ge.s32.totalorder %s16_s17, 4   ;;  %s1008_s13 = smov %s814_s14 }
 0x363   : > { %s1009_s14 = smov %s905_s24  ;;  %s1010_s15 = smov %s822_s16 }
 0x364   : > { %s1011_s16 = smov %s1013_s19  ;;  %15 = sbr.rel (!%p13_p8) target bundleno = 4 (0x4), region = 80 }
 0x369   :  { %560 = vsyncpa [#allocation5], 1 }
 0x36a   :  { %562 = vsyncpa [#allocation5 + $0x1], 1 }

</bundles_post_ra>
